<compile_context>
chip_gen: v5e
topology: v5e:2x2
jax: 0.10.0
libtpu: 0.0.40
codegen_flags: <defaults>
</compile_context>

<pallas_src>
import jax
import jax.numpy as jnp
from jax.experimental import pallas as pl
from jax.experimental.pallas import tpu as pltpu


HIDDEN = 64
SUBLANE = 8


def _round_up(v, m):
    return ((v + m - 1) // m) * m


def _cdiv(a, b):
    return (a + b - 1) // b


def _mlp_kernel(x_ref,
                w1_ref, b1_ref,
                w2_ref, b2_ref,
                w3_ref, b3_ref,
                w4_ref, b4_ref,
                o_ref):
    # MXU operands are in the compute dtype (bf16 by default); accumulation is
    # forced to f32 via preferred_element_type; bias/ReLU stay f32 on the VPU.
    cdt = w1_ref.dtype

    h = jnp.dot(x_ref[...], w1_ref[...],
                preferred_element_type=jnp.float32) + b1_ref[...]
    h = jnp.maximum(h, 0.0)

    h = jnp.dot(h.astype(cdt), w2_ref[...],
                preferred_element_type=jnp.float32) + b2_ref[...]
    h = jnp.maximum(h, 0.0)

    h = jnp.dot(h.astype(cdt), w3_ref[...],
                preferred_element_type=jnp.float32) + b3_ref[...]
    h = jnp.maximum(h, 0.0)

    # Dropout(0.2): identity in eval mode.
    # TODO(synk): training-mode dropout with pltpu.prng_random_bits.

    out = jnp.dot(h.astype(cdt), w4_ref[...],
                  preferred_element_type=jnp.float32) + b4_ref[...]
    o_ref[...] = out.astype(o_ref.dtype)


def _choose_batch_tile(B, *, cap_rows=4096, split_threshold=1024):
    """Pick an 8-aligned batch tile.

    Large batches: target ~cap_rows per step (amortizes the ~0.35us grid-step
    overhead) while keeping >= 2 (balanced) steps so both v7x TensorCores are
    busy. Small batches: a single ragged-clipped step.
    """
    B8 = _round_up(max(B, 1), SUBLANE)
    if B8 < split_threshold:
        return B8
    steps = max(2, _cdiv(B8, cap_rows))
    return _round_up(_cdiv(B8, steps), SUBLANE)


def fcn_ae_debug_forward(x, params, *, batch_tile=None,
                         compute_dtype=jnp.bfloat16):
    """x: (B, input_size). params: w1..w4 (in_features, out_features), b1..b4
    (1, out_features). Returns (B, output_size) in x.dtype."""
    B, In = x.shape
    Out = params["w4"].shape[1]
    out_dtype = x.dtype

    # MXU operand dtype (bf16 by default -> single-pass MXU, halved x read).
    x_c = x.astype(compute_dtype)
    w1 = params["w1"].astype(compute_dtype)
    w2 = params["w2"].astype(compute_dtype)
    w3 = params["w3"].astype(compute_dtype)
    w4 = params["w4"].astype(compute_dtype)
    b1 = params["b1"].astype(jnp.float32)
    b2 = params["b2"].astype(jnp.float32)
    b3 = params["b3"].astype(jnp.float32)
    b4 = params["b4"].astype(jnp.float32)

    # --- batch tile ---
    if batch_tile is None:
        batch_tile = _choose_batch_tile(B)
    batch_tile = max(SUBLANE, (int(batch_tile) // SUBLANE) * SUBLANE)
    batch_tile = min(batch_tile, _round_up(B, SUBLANE))

    grid = (_cdiv(B, batch_tile),)  # ragged last block clipped by Pallas

    def full_spec(arr):
        nd = arr.ndim
        return pl.BlockSpec(arr.shape, lambda i, _nd=nd: (0,) * _nd)

    in_specs = [
        pl.BlockSpec((batch_tile, In), lambda i: (i, 0)),
        full_spec(w1), full_spec(b1),
        full_spec(w2), full_spec(b2),
        full_spec(w3), full_spec(b3),
        full_spec(w4), full_spec(b4),
    ]
    # Un-padded, exact-width output block (Out == full last dim of the array).
    out_spec = pl.BlockSpec((batch_tile, Out), lambda i: (i, 0))

    # --- cost estimate (un-padded widths, actual dtypes) ---
    csize = jnp.dtype(compute_dtype).itemsize
    osize = jnp.dtype(out_dtype).itemsize
    weight_bytes = sum(int(a.size) * jnp.dtype(a.dtype).itemsize
                       for a in (w1, b1, w2, b2, w3, b3, w4, b4))
    flops = 2 * B * (In * HIDDEN + 2 * HIDDEN * HIDDEN + HIDDEN * Out)
    bytes_accessed = B * In * csize + B * Out * osize + weight_bytes
    cost = pl.CostEstimate(flops=flops, transcendentals=0,
                           bytes_accessed=bytes_accessed)

    # --- VMEM limit: double-buffered x/out tiles + tiny weights + generous
    #     room for f32 layer intermediates, plus modest headroom. Kept tight
    #     so neighboring fusions keep their VMEM (v7x has only 64 MiB/TC). ---
    needed = (2 * batch_tile * In * csize
              + 2 * batch_tile * Out * osize
              + 2 * weight_bytes
              + 6 * batch_tile * HIDDEN * 4)
    vmem_limit = int(min(max(needed + (8 << 20), 16 << 20), 40 << 20))

    out = pl.pallas_call(
        _mlp_kernel,
        out_shape=jax.ShapeDtypeStruct((B, Out), out_dtype),
        grid_spec=pltpu.PrefetchScalarGridSpec(
            num_scalar_prefetch=0,
            grid=grid,
            in_specs=in_specs,
            out_specs=out_spec,
        ),
        compiler_params=pltpu.CompilerParams(
            dimension_semantics=("parallel",),
            vmem_limit_bytes=vmem_limit),
        cost_estimate=cost,
    )(x_c, w1, b1, w2, b2, w3, b3, w4, b4)

    return out


def init_params(key, input_size, output_size):
    """PyTorch nn.Linear default init: U(-1/sqrt(fan_in), 1/sqrt(fan_in)).
    Weights stored as (in_features, out_features) so the kernel does x @ W."""
    dims = [(input_size, HIDDEN), (HIDDEN, HIDDEN),
            (HIDDEN, HIDDEN), (HIDDEN, output_size)]
    params = {}
    for idx, (fan_in, fan_out) in enumerate(dims, start=1):
        key, kw, kb = jax.random.split(key, 3)
        bound = 1.0 / (fan_in ** 0.5)
        params[f"w{idx}"] = jax.random.uniform(
            kw, (fan_in, fan_out), jnp.float32, minval=-bound, maxval=bound)
        params[f"b{idx}"] = jax.random.uniform(
            kb, (1, fan_out), jnp.float32, minval=-bound, maxval=bound)
    return params


def reference_forward(x, params, compute_dtype=jnp.float32):
    """Pure-JAX reference with the same operand rounding as the kernel."""
    f32 = jnp.float32

    def dense(h, w, b):
        return (jnp.dot(h.astype(compute_dtype).astype(f32),
                        w.astype(compute_dtype).astype(f32),
                        preferred_element_type=f32)
                + b.astype(f32))

    h = jnp.maximum(dense(x, params["w1"], params["b1"]), 0.0)
    h = jnp.maximum(dense(h, params["w2"], params["b2"]), 0.0)
    h = jnp.maximum(dense(h, params["w3"], params["b3"]), 0.0)
    return dense(h, params["w4"], params["b4"])


if __name__ == "__main__":
    key = jax.random.PRNGKey(0)
    k_params, k1, k2, k3 = jax.random.split(key, 4)

    input_size, output_size = 32, 16
    params = init_params(k_params, input_size, output_size)

    # Case 1: multi-step grid, explicit tile, bf16 MXU operands (default path).
    x1 = jax.random.normal(k1, (256, input_size), dtype=jnp.float32)
    out1 = jax.block_until_ready(fcn_ae_debug_forward(x1, params, batch_tile=128))
    ref1 = reference_forward(x1, params, compute_dtype=jnp.bfloat16)
    assert out1.shape == (256, output_size)
    assert jnp.allclose(out1, ref1, atol=2e-3, rtol=2e-3), "case1 mismatch"

    # Case 2: ragged batch (not a multiple of 8), default tile heuristic;
    # exercises clipped last-block writeback (no host-side pad/slice passes).
    x2 = jax.random.normal(k2, (100, input_size), dtype=jnp.float32)
    out2 = jax.block_until_ready(fcn_ae_debug_forward(x2, params))
    ref2 = reference_forward(x2, params, compute_dtype=jnp.bfloat16)
    assert out2.shape == (100, output_size)
    assert jnp.allclose(out2, ref2, atol=2e-3, rtol=2e-3), "case2 mismatch"

    # Case 3: strict f32 compute path vs f32 reference.
    x3 = jax.random.normal(k3, (64, input_size), dtype=jnp.float32)
    out3 = jax.block_until_ready(
        fcn_ae_debug_forward(x3, params, compute_dtype=jnp.float32))
    ref3 = reference_forward(x3, params, compute_dtype=jnp.float32)
    assert out3.shape == (64, output_size)
    assert jnp.allclose(out3, ref3, atol=1e-5, rtol=1e-5), "case3 mismatch"

    print("KERNEL_OK")
</pallas_src>

<mosaic_0001>
module attributes {stable_mosaic.version = 11 : i64} {
  func.func @_mlp_kernel(%arg0: i32, %arg1: memref<128x32xbf16, #tpu.memory_space<vmem>>, %arg2: memref<32x64xbf16, #tpu.memory_space<vmem>>, %arg3: memref<1x64xf32, #tpu.memory_space<vmem>>, %arg4: memref<64x64xbf16, #tpu.memory_space<vmem>>, %arg5: memref<1x64xf32, #tpu.memory_space<vmem>>, %arg6: memref<64x64xbf16, #tpu.memory_space<vmem>>, %arg7: memref<1x64xf32, #tpu.memory_space<vmem>>, %arg8: memref<64x16xbf16, #tpu.memory_space<vmem>>, %arg9: memref<1x16xf32, #tpu.memory_space<vmem>>, %arg10: memref<128x16xf32, #tpu.memory_space<vmem>>) attributes {dimension_semantics = [#tpu.dimension_semantics<parallel>], iteration_bounds = array<i64: 2>, scalar_prefetch = 0 : i64, scratch_operands = 0 : i64, tpu.core_type = #tpu.core_type<tc>, window_params = [{transform_indices = @transform_0, window_bounds = array<i64: 128, 32>}, {pipeline_mode = #tpu.pipeline_mode<synchronous>, transform_indices = @transform_1, window_bounds = array<i64: 32, 64>}, {pipeline_mode = #tpu.pipeline_mode<synchronous>, transform_indices = @transform_2, window_bounds = array<i64: 1, 64>}, {pipeline_mode = #tpu.pipeline_mode<synchronous>, transform_indices = @transform_3, window_bounds = array<i64: 64, 64>}, {pipeline_mode = #tpu.pipeline_mode<synchronous>, transform_indices = @transform_4, window_bounds = array<i64: 1, 64>}, {pipeline_mode = #tpu.pipeline_mode<synchronous>, transform_indices = @transform_5, window_bounds = array<i64: 64, 64>}, {pipeline_mode = #tpu.pipeline_mode<synchronous>, transform_indices = @transform_6, window_bounds = array<i64: 1, 64>}, {pipeline_mode = #tpu.pipeline_mode<synchronous>, transform_indices = @transform_7, window_bounds = array<i64: 64, 16>}, {pipeline_mode = #tpu.pipeline_mode<synchronous>, transform_indices = @transform_8, window_bounds = array<i64: 1, 16>}, {transform_indices = @transform_9, window_bounds = array<i64: 128, 16>}]} {
    %c0 = arith.constant 0 : index
    %c0_0 = arith.constant 0 : index
    %0 = vector.load %arg1[%c0, %c0_0] : memref<128x32xbf16, #tpu.memory_space<vmem>>, vector<128x32xbf16>
    %c0_1 = arith.constant 0 : index
    %c0_2 = arith.constant 0 : index
    %1 = vector.load %arg2[%c0_1, %c0_2] : memref<32x64xbf16, #tpu.memory_space<vmem>>, vector<32x64xbf16>
    %cst = arith.constant dense<0.000000e+00> : vector<128x64xf32>
    %2 = tpu.matmul %0, %1, %cst {dimension_numbers = #tpu.dot_dimension_numbers<[1], [0], [0], [1], [0, 0, 1, 1], [], []>} : vector<128x32xbf16>, vector<32x64xbf16>, vector<128x64xf32> -> vector<128x64xf32>
    %c0_3 = arith.constant 0 : index
    %c0_4 = arith.constant 0 : index
    %3 = vector.load %arg3[%c0_3, %c0_4] : memref<1x64xf32, #tpu.memory_space<vmem>>, vector<1x64xf32>
    %4 = vector.broadcast %3 : vector<1x64xf32> to vector<128x64xf32>
    %5 = arith.addf %2, %4 : vector<128x64xf32>
    %cst_5 = arith.constant 0.000000e+00 : f32
    %6 = vector.broadcast %cst_5 : f32 to vector<128x64xf32>
    %7 = arith.maximumf %5, %6 : vector<128x64xf32>
    %8 = arith.truncf %7 : vector<128x64xf32> to vector<128x64xbf16>
    %c0_6 = arith.constant 0 : index
    %c0_7 = arith.constant 0 : index
    %9 = vector.load %arg4[%c0_6, %c0_7] : memref<64x64xbf16, #tpu.memory_space<vmem>>, vector<64x64xbf16>
    %cst_8 = arith.constant dense<0.000000e+00> : vector<128x64xf32>
    %10 = tpu.matmul %8, %9, %cst_8 {dimension_numbers = #tpu.dot_dimension_numbers<[1], [0], [0], [1], [0, 0, 1, 1], [], []>} : vector<128x64xbf16>, vector<64x64xbf16>, vector<128x64xf32> -> vector<128x64xf32>
    %c0_9 = arith.constant 0 : index
    %c0_10 = arith.constant 0 : index
    %11 = vector.load %arg5[%c0_9, %c0_10] : memref<1x64xf32, #tpu.memory_space<vmem>>, vector<1x64xf32>
    %12 = vector.broadcast %11 : vector<1x64xf32> to vector<128x64xf32>
    %13 = arith.addf %10, %12 : vector<128x64xf32>
    %cst_11 = arith.constant 0.000000e+00 : f32
    %14 = vector.broadcast %cst_11 : f32 to vector<128x64xf32>
    %15 = arith.maximumf %13, %14 : vector<128x64xf32>
    %16 = arith.truncf %15 : vector<128x64xf32> to vector<128x64xbf16>
    %c0_12 = arith.constant 0 : index
    %c0_13 = arith.constant 0 : index
    %17 = vector.load %arg6[%c0_12, %c0_13] : memref<64x64xbf16, #tpu.memory_space<vmem>>, vector<64x64xbf16>
    %cst_14 = arith.constant dense<0.000000e+00> : vector<128x64xf32>
    %18 = tpu.matmul %16, %17, %cst_14 {dimension_numbers = #tpu.dot_dimension_numbers<[1], [0], [0], [1], [0, 0, 1, 1], [], []>} : vector<128x64xbf16>, vector<64x64xbf16>, vector<128x64xf32> -> vector<128x64xf32>
    %c0_15 = arith.constant 0 : index
    %c0_16 = arith.constant 0 : index
    %19 = vector.load %arg7[%c0_15, %c0_16] : memref<1x64xf32, #tpu.memory_space<vmem>>, vector<1x64xf32>
    %20 = vector.broadcast %19 : vector<1x64xf32> to vector<128x64xf32>
    %21 = arith.addf %18, %20 : vector<128x64xf32>
    %cst_17 = arith.constant 0.000000e+00 : f32
    %22 = vector.broadcast %cst_17 : f32 to vector<128x64xf32>
    %23 = arith.maximumf %21, %22 : vector<128x64xf32>
    %24 = arith.truncf %23 : vector<128x64xf32> to vector<128x64xbf16>
    %c0_18 = arith.constant 0 : index
    %c0_19 = arith.constant 0 : index
    %25 = vector.load %arg8[%c0_18, %c0_19] : memref<64x16xbf16, #tpu.memory_space<vmem>>, vector<64x16xbf16>
    %cst_20 = arith.constant dense<0.000000e+00> : vector<128x16xf32>
    %26 = tpu.matmul %24, %25, %cst_20 {dimension_numbers = #tpu.dot_dimension_numbers<[1], [0], [0], [1], [0, 0, 1, 1], [], []>} : vector<128x64xbf16>, vector<64x16xbf16>, vector<128x16xf32> -> vector<128x16xf32>
    %c0_21 = arith.constant 0 : index
    %c0_22 = arith.constant 0 : index
    %27 = vector.load %arg9[%c0_21, %c0_22] : memref<1x16xf32, #tpu.memory_space<vmem>>, vector<1x16xf32>
    %28 = vector.broadcast %27 : vector<1x16xf32> to vector<128x16xf32>
    %29 = arith.addf %26, %28 : vector<128x16xf32>
    %c0_23 = arith.constant 0 : index
    %c0_24 = arith.constant 0 : index
    %30 = vector.load %arg10[%c0_23, %c0_24] : memref<128x16xf32, #tpu.memory_space<vmem>>, vector<128x16xf32>
    tpu.vector_store %arg10[%c0_23, %c0_24], %29 {strides = array<i32>} : memref<128x16xf32, #tpu.memory_space<vmem>>, vector<128x16xf32>,
    return
  }
  func.func @transform_0(%arg0: i32) -> (i32, i32) {
    %c0_i32 = arith.constant 0 : i32
    %c0_i32_0 = arith.constant 0 : i32
    return %arg0, %c0_i32 : i32, i32
  }
  func.func @transform_1(%arg0: i32) -> (i32, i32) {
    %c0_i32 = arith.constant 0 : i32
    %c0_i32_0 = arith.constant 0 : i32
    %c0_i32_1 = arith.constant 0 : i32
    return %c0_i32, %c0_i32_0 : i32, i32
  }
  func.func @transform_2(%arg0: i32) -> (i32, i32) {
    %c0_i32 = arith.constant 0 : i32
    %c0_i32_0 = arith.constant 0 : i32
    %c0_i32_1 = arith.constant 0 : i32
    return %c0_i32, %c0_i32_0 : i32, i32
  }
  func.func @transform_3(%arg0: i32) -> (i32, i32) {
    %c0_i32 = arith.constant 0 : i32
    %c0_i32_0 = arith.constant 0 : i32
    %c0_i32_1 = arith.constant 0 : i32
    return %c0_i32, %c0_i32_0 : i32, i32
  }
  func.func @transform_4(%arg0: i32) -> (i32, i32) {
    %c0_i32 = arith.constant 0 : i32
    %c0_i32_0 = arith.constant 0 : i32
    %c0_i32_1 = arith.constant 0 : i32
    return %c0_i32, %c0_i32_0 : i32, i32
  }
  func.func @transform_5(%arg0: i32) -> (i32, i32) {
    %c0_i32 = arith.constant 0 : i32
    %c0_i32_0 = arith.constant 0 : i32
    %c0_i32_1 = arith.constant 0 : i32
    return %c0_i32, %c0_i32_0 : i32, i32
  }
  func.func @transform_6(%arg0: i32) -> (i32, i32) {
    %c0_i32 = arith.constant 0 : i32
    %c0_i32_0 = arith.constant 0 : i32
    %c0_i32_1 = arith.constant 0 : i32
    return %c0_i32, %c0_i32_0 : i32, i32
  }
  func.func @transform_7(%arg0: i32) -> (i32, i32) {
    %c0_i32 = arith.constant 0 : i32
    %c0_i32_0 = arith.constant 0 : i32
    %c0_i32_1 = arith.constant 0 : i32
    return %c0_i32, %c0_i32_0 : i32, i32
  }
  func.func @transform_8(%arg0: i32) -> (i32, i32) {
    %c0_i32 = arith.constant 0 : i32
    %c0_i32_0 = arith.constant 0 : i32
    %c0_i32_1 = arith.constant 0 : i32
    return %c0_i32, %c0_i32_0 : i32, i32
  }
  func.func @transform_9(%arg0: i32) -> (i32, i32) {
    %c0_i32 = arith.constant 0 : i32
    %c0_i32_0 = arith.constant 0 : i32
    return %arg0, %c0_i32 : i32, i32
  }
}

</mosaic_0001>

<bundles_post_ra>
// kernel: tpu_custom_call.1
= control target key start
LH: loop header
LB: loop body
LE: loop exit
PB: predicated region body
PF: predicated region fallthrough
CT: control target
= control target key end

     0   :  { %s1183_s30 = smov 0   ;;  %s1360_s0 = inlined_call_operand.vmem [shape: bf16[256,32], index: 0, kind: input, shape index: {}]   ;;  %s1361_s1 = inlined_call_operand.vmem [shape: bf16[32,64], index: 1, kind: input, shape index: {}]   ;;  %s1362_s2 = inlined_call_operand.vmem [shape: f32[1,64], index: 2, kind: input, shape index: {}]   ;;  %s1363_s3 = inlined_call_operand.vmem [shape: bf16[64,64], index: 3, kind: input, shape index: {}]   ;;  %s1364_s4 = inlined_call_operand.vmem [shape: f32[1,64], index: 4, kind: input, shape index: {}]   ;;  %s1365_s5 = inlined_call_operand.vmem [shape: bf16[64,64], index: 5, kind: input, shape index: {}]   ;;  %s1366_s6 = inlined_call_operand.vmem [shape: f32[1,64], index: 6, kind: input, shape index: {}]   ;;  %s1367_s7 = inlined_call_operand.vmem [shape: bf16[64,16], index: 7, kind: input, shape index: {}]   ;;  %s1368_s8 = inlined_call_operand.vmem [shape: f32[1,16], index: 8, kind: input, shape index: {}]   ;;  %s1369_s9 = inlined_call_operand.vmem [shape: f32[256,16], index: 9, kind: output, shape index: {}]  }
   0x1 LB: > { %s960_s10 = sadd.s32 4294967295, %s1131_s30   ;;  %p964_p0 = scmp.ge.s32.totalorder %s1131_s30, 1  ;;  %s1131_s30 = sphi %s1183_s30, %s19_s30  }
   0x2   : > { %p288_p1 = scmp.lt.s32.totalorder %s1131_s30, 3 }
   0x4   : > { %p289_p2 = pnand %p964_p0, %p288_p1 }
   0x5   : > { %s965_s13 = sshll.u32 (!%p289_p2), %s960_s10, 4 }
   0x6   : > { %292 = sbr.rel (%p289_p2) target bundleno = 700 (0x2bc), region = 56  ;;  %p325_p3 = scmp.lt.s32.totalorder (!%p289_p2), %s965_s13, 31 }
   0xb   : > { %v1100_v0 = vld [vmem:[%s1361_s1 + $0x8] sm:$0xff]  ;;  %v1099_v1 = vld [vmem:[%s1361_s1] sm:$0xff]  ;;  %s1371_s13 = smov (!%p325_p3, %s965_s13), 31  ;;  %vm413_vm0 = vcmask 261120   ;;  %v1104_v8 = vld [vmem:[%s1363_s3 + $0x18] sm:$0xff]  ;;  %vm547_vm1 = vcmask 523264  }
   0xc   : > { %444 = vmatpush.bf16.msra.mxu0 %v1100_v0  ;;  %s966_s16 = sshll.u32 %s1371_s13, 2  ;;  %576 = vmatpush.bf16.msra.mxu1 %v1104_v8  ;;  %v1103_v10 = vld [vmem:[%s1363_s3 + $0x10] sm:$0xff]  ;;  %v1102_v11 = vld [vmem:[%s1363_s3 + $0x8] sm:$0xff]  ;;  %v1101_v12 = vld [vmem:[%s1363_s3] sm:$0xff]  ;;  %s968_s11 = sshll.u32 %s1371_s13, 3  ;;  %vm887_vm2 = vcmask 130048  }
   0xd   : > { %s328_s19 = scalar_lea.vmem %s1360_s0, %s966_s16  ;;  %v1226_v15 = vld [vmem:[%s1362_s2] ss:$0 sm:$0xff]  ;;  %v1108_v61 = vld [vmem:[%s1365_s5 + $0x18] sm:$0xff]  ;;  %s1323_s17 = scalar_lea.vmem %s1369_s9, %s968_s11 }
   0xe   : > { %v1091_v2 = vld [vmem:[%s328_s19] sm:$0xff]  ;;  %v1092_v3 = vld [vmem:[%s328_s19 + $0x8] sm:$0xff]  ;;  %v1093_v4 = vld [vmem:[%s328_s19 + $0x10] sm:$0xff]  ;;  %709 = vmatpush.bf16.msra.mxu2 %v1108_v61 }
   0xf   : > { %v1094_v5 = vld [vmem:[%s328_s19 + $0x18] sm:$0xff]  ;;  %v1095_v6 = vld [vmem:[%s328_s19 + $0x20] sm:$0xff]  ;;  %v1096_v7 = vld [vmem:[%s328_s19 + $0x28] sm:$0xff] }
  0x10   : > { %445 = vmatpush.bf16.msra.mxu0 %v1099_v1  ;;  %v1097_v9 = vld [vmem:[%s328_s19 + $0x30] sm:$0xff]  ;;  %577 = vmatpush.bf16.msra.mxu1 %v1103_v10  ;;  %v1098_v13 = vld [vmem:[%s328_s19 + $0x38] sm:$0xff] }
  0x11   : > { %v1107_v1 = vld [vmem:[%s1365_s5 + $0x10] sm:$0xff] }
  0x12   : > { %710 = vmatpush.bf16.msra.mxu2 %v1107_v1 }
  0x13   : > { %1009 = vmatmul.msk.bf16.vlgmr.msra.gmra.mxu0 %vm413_vm0, %v1091_v2 }
  0x14   : > { %578 = vmatpush.bf16.msra.mxu1 %v1102_v11 }
  0x18   : > { %579 = vmatpush.bf16.msra.mxu1 %v1101_v12  ;;  %v1267_v12 = vld [vmem:[%s1364_s4] ss:$0 sm:$0xff] }
  0x23   : > { %1010 = vmatmul.msk.bf16.gmra.mxu0 %vm413_vm0, %v1092_v3  ;;  %v1106_v3 = vld [vmem:[%s1365_s5 + $0x8] sm:$0xff] }
  0x24   : > { %711 = vmatpush.bf16.msra.mxu2 %v1106_v3 }
  0x33   : > { %1011 = vmatmul.msk.bf16.gmra.mxu0 %vm413_vm0, %v1093_v4  ;;  %v1105_v4 = vld [vmem:[%s1365_s5] sm:$0xff] }
  0x34   : > { %712 = vmatpush.bf16.msra.mxu2 %v1105_v4 }
  0x43   : > { %1012 = vmatmul.msk.bf16.gmra.mxu0 %vm413_vm0, %v1094_v5 }
  0x53   : > { %1013 = vmatmul.msk.bf16.gmra.mxu0 %vm413_vm0, %v1095_v6 }
  0x63   : > { %1014 = vmatmul.msk.bf16.gmra.mxu0 %vm413_vm0, %v1096_v7 }
  0x73   : > { %1015 = vmatmul.msk.bf16.gmra.mxu0 %vm413_vm0, %v1097_v9 }
  0x83   : > { %1016 = vmatmul.msk.bf16.gmra.mxu0 %vm413_vm0, %v1098_v13 }
  0x90   : > { %v447_v14 = vpop.f32.mrf.mxu0 }
  0x91   : > { %v448_v16 = vadd.f32 %v1226_v15, %v447_v14 }
  0x93   : > { %v487_v19 = vmax.f32 %v448_v16, 0.0 }
  0x98   : > { %v449_v17 = vpop.f32.mrf.mxu0 }
  0x99   : > { %v450_v18 = vadd.f32 %v1226_v15, %v449_v17 }
  0x9b   : > { %v488_v20 = vmax.f32 %v450_v18, 0.0 }
  0x9d   : > { %v503_v21 = vpack.c.bf16 %v488_v20, %v487_v19 }
  0x9f   : > { %1033 = vmatmul.msk.bf16.vlgmr.msra.gmra.mxu1 %vm547_vm1, %v503_v21 }
  0xa0   : > { %v452_v22 = vpop.f32.mrf.mxu0 }
  0xa1   : > { %v453_v23 = vadd.f32 %v1226_v15, %v452_v22 }
  0xa3   : > { %v489_v26 = vmax.f32 %v453_v23, 0.0 }
  0xa8   : > { %v454_v24 = vpop.f32.mrf.mxu0 }
  0xa9   : > { %v455_v25 = vadd.f32 %v1226_v15, %v454_v24 }
  0xab   : > { %v490_v27 = vmax.f32 %v455_v25, 0.0 }
  0xad   : > { %v504_v28 = vpack.c.bf16 %v490_v27, %v489_v26 }
  0xaf   : > { %1034 = vmatmul.msk.bf16.gmra.mxu1 %vm547_vm1, %v504_v28 }
  0xb0   : > { %v457_v29 = vpop.f32.mrf.mxu0 }
  0xb1   : > { %v458_v30 = vadd.f32 %v1226_v15, %v457_v29 }
  0xb3   : > { %v491_v33 = vmax.f32 %v458_v30, 0.0 }
  0xb8   : > { %v459_v31 = vpop.f32.mrf.mxu0 }
  0xb9   : > { %v460_v32 = vadd.f32 %v1226_v15, %v459_v31 }
  0xbb   : > { %v492_v34 = vmax.f32 %v460_v32, 0.0 }
  0xbd   : > { %v505_v35 = vpack.c.bf16 %v492_v34, %v491_v33 }
  0xbf   : > { %1035 = vmatmul.msk.bf16.gmra.mxu1 %vm547_vm1, %v505_v35 }
  0xc0   : > { %v462_v36 = vpop.f32.mrf.mxu0 }
  0xc1   : > { %v463_v37 = vadd.f32 %v1226_v15, %v462_v36 }
  0xc3   : > { %v493_v40 = vmax.f32 %v463_v37, 0.0 }
  0xc8   : > { %v464_v38 = vpop.f32.mrf.mxu0 }
  0xc9   : > { %v465_v39 = vadd.f32 %v1226_v15, %v464_v38 }
  0xcb   : > { %v494_v41 = vmax.f32 %v465_v39, 0.0 }
  0xcd   : > { %v506_v42 = vpack.c.bf16 %v494_v41, %v493_v40 }
  0xcf   : > { %1036 = vmatmul.msk.bf16.gmra.mxu1 %vm547_vm1, %v506_v42 }
  0xd0   : > { %v467_v43 = vpop.f32.mrf.mxu0 }
  0xd1   : > { %v468_v44 = vadd.f32 %v1226_v15, %v467_v43 }
  0xd3   : > { %v495_v47 = vmax.f32 %v468_v44, 0.0 }
  0xd8   : > { %v469_v45 = vpop.f32.mrf.mxu0 }
  0xd9   : > { %v470_v46 = vadd.f32 %v1226_v15, %v469_v45 }
  0xdb   : > { %v496_v48 = vmax.f32 %v470_v46, 0.0 }
  0xdd   : > { %v507_v49 = vpack.c.bf16 %v496_v48, %v495_v47 }
  0xdf   : > { %1037 = vmatmul.msk.bf16.gmra.mxu1 %vm547_vm1, %v507_v49 }
  0xe0   : > { %v472_v50 = vpop.f32.mrf.mxu0 }
  0xe1   : > { %v473_v51 = vadd.f32 %v1226_v15, %v472_v50 }
  0xe3   : > { %v497_v54 = vmax.f32 %v473_v51, 0.0 }
  0xe8   : > { %v474_v52 = vpop.f32.mrf.mxu0 }
  0xe9   : > { %v475_v53 = vadd.f32 %v1226_v15, %v474_v52 }
  0xeb   : > { %v498_v55 = vmax.f32 %v475_v53, 0.0 }
  0xed   : > { %v508_v56 = vpack.c.bf16 %v498_v55, %v497_v54 }
  0xef   : > { %1038 = vmatmul.msk.bf16.gmra.mxu1 %vm547_vm1, %v508_v56 }
  0xf0   : > { %v477_v57 = vpop.f32.mrf.mxu0 }
  0xf1   : > { %v478_v58 = vadd.f32 %v1226_v15, %v477_v57 }
  0xf3   : > { %v499_v62 = vmax.f32 %v478_v58, 0.0 }
  0xf8   : > { %v479_v59 = vpop.f32.mrf.mxu0 }
  0xf9   : > { %v480_v60 = vadd.f32 %v1226_v15, %v479_v59 }
  0xfb   : > { %v500_v63 = vmax.f32 %v480_v60, 0.0 }
  0xfd   : > { %v509_v0 = vpack.c.bf16 %v500_v63, %v499_v62  ;;  %v1112_v62 = vld [vmem:[%s1367_s7 + $0x18] sm:$0xff]  ;;  %v1111_v63 = vld [vmem:[%s1367_s7 + $0x10] sm:$0xff] }
  0xfe   : > { %842 = vmatpush.bf16.msra.mxu3 %v1112_v62 }
  0xff   : > { %1039 = vmatmul.msk.bf16.gmra.mxu1 %vm547_vm1, %v509_v0 }
 0x100   : > { %v482_v2 = vpop.f32.mrf.mxu0 }
 0x101   : > { %v483_v5 = vadd.f32 %v1226_v15, %v482_v2  ;;  %v1110_v2 = vld [vmem:[%s1367_s7 + $0x8] sm:$0xff] }
 0x102   : > { %843 = vmatpush.bf16.msra.mxu3 %v1111_v63 }
 0x103   : > { %v501_v8 = vmax.f32 %v483_v5, 0.0 }
 0x106   : > { %844 = vmatpush.bf16.msra.mxu3 %v1110_v2 }
 0x108   : > { %v484_v6 = vpop.f32.mrf.mxu0 }
 0x109   : > { %v485_v7 = vadd.f32 %v1226_v15, %v484_v6  ;;  %v1109_v6 = vld [vmem:[%s1367_s7] sm:$0xff] }
 0x10a   : > { %845 = vmatpush.bf16.msra.mxu3 %v1109_v6 }
 0x10b   : > { %v502_v9 = vmax.f32 %v485_v7, 0.0 }
 0x10d   : > { %v510_v10 = vpack.c.bf16 %v502_v9, %v501_v8  ;;  %v1123_v9 = vld [vmem:[%s1366_s6] ss:$0 sm:$0xff] }
 0x10f   : > { %1040 = vmatmul.msk.bf16.gmra.mxu1 %vm547_vm1, %v510_v10 }
 0x11c   : > { %v581_v11 = vpop.f32.mrf.mxu1 }
 0x11d   : > { %v582_v13 = vadd.f32 %v1267_v12, %v581_v11 }
 0x11f   : > { %v621_v17 = vmax.f32 %v582_v13, 0.0 }
 0x124   : > { %v583_v14 = vpop.f32.mrf.mxu1 }
 0x125   : > { %v584_v16 = vadd.f32 %v1267_v12, %v583_v14 }
 0x127   : > { %v622_v18 = vmax.f32 %v584_v16, 0.0 }
 0x129   : > { %v637_v19 = vpack.c.bf16 %v622_v18, %v621_v17 }
 0x12b   : > { %1057 = vmatmul.msk.bf16.vlgmr.msra.gmra.mxu2 %vm547_vm1, %v637_v19 }
 0x12c   : > { %v586_v15 = vpop.f32.mrf.mxu1 }
 0x12d   : > { %v587_v20 = vadd.f32 %v1267_v12, %v586_v15 }
 0x12f   : > { %v623_v23 = vmax.f32 %v587_v20, 0.0 }
 0x134   : > { %v588_v21 = vpop.f32.mrf.mxu1 }
 0x135   : > { %v589_v22 = vadd.f32 %v1267_v12, %v588_v21 }
 0x137   : > { %v624_v24 = vmax.f32 %v589_v22, 0.0 }
 0x139   : > { %v638_v25 = vpack.c.bf16 %v624_v24, %v623_v23 }
 0x13b   : > { %1058 = vmatmul.msk.bf16.gmra.mxu2 %vm547_vm1, %v638_v25 }
 0x13c   : > { %v591_v26 = vpop.f32.mrf.mxu1 }
 0x13d   : > { %v592_v27 = vadd.f32 %v1267_v12, %v591_v26 }
 0x13f   : > { %v625_v30 = vmax.f32 %v592_v27, 0.0 }
 0x144   : > { %v593_v28 = vpop.f32.mrf.mxu1 }
 0x145   : > { %v594_v29 = vadd.f32 %v1267_v12, %v593_v28 }
 0x147   : > { %v626_v31 = vmax.f32 %v594_v29, 0.0 }
 0x149   : > { %v639_v32 = vpack.c.bf16 %v626_v31, %v625_v30 }
 0x14b   : > { %1059 = vmatmul.msk.bf16.gmra.mxu2 %vm547_vm1, %v639_v32 }
 0x14c   : > { %v596_v33 = vpop.f32.mrf.mxu1 }
 0x14d   : > { %v597_v34 = vadd.f32 %v1267_v12, %v596_v33 }
 0x14f   : > { %v627_v37 = vmax.f32 %v597_v34, 0.0 }
 0x154   : > { %v598_v35 = vpop.f32.mrf.mxu1 }
 0x155   : > { %v599_v36 = vadd.f32 %v1267_v12, %v598_v35 }
 0x157   : > { %v628_v38 = vmax.f32 %v599_v36, 0.0 }
 0x159   : > { %v640_v39 = vpack.c.bf16 %v628_v38, %v627_v37 }
 0x15b   : > { %1060 = vmatmul.msk.bf16.gmra.mxu2 %vm547_vm1, %v640_v39 }
 0x15c   : > { %v601_v40 = vpop.f32.mrf.mxu1 }
 0x15d   : > { %v602_v41 = vadd.f32 %v1267_v12, %v601_v40 }
 0x15f   : > { %v629_v44 = vmax.f32 %v602_v41, 0.0 }
 0x164   : > { %v603_v42 = vpop.f32.mrf.mxu1 }
 0x165   : > { %v604_v43 = vadd.f32 %v1267_v12, %v603_v42 }
 0x167   : > { %v630_v45 = vmax.f32 %v604_v43, 0.0 }
 0x169   : > { %v641_v46 = vpack.c.bf16 %v630_v45, %v629_v44 }
 0x16b   : > { %1061 = vmatmul.msk.bf16.gmra.mxu2 %vm547_vm1, %v641_v46 }
 0x16c   : > { %v606_v47 = vpop.f32.mrf.mxu1 }
 0x16d   : > { %v607_v48 = vadd.f32 %v1267_v12, %v606_v47 }
 0x16f   : > { %v631_v51 = vmax.f32 %v607_v48, 0.0 }
 0x174   : > { %v608_v49 = vpop.f32.mrf.mxu1 }
 0x175   : > { %v609_v50 = vadd.f32 %v1267_v12, %v608_v49 }
 0x177   : > { %v632_v52 = vmax.f32 %v609_v50, 0.0 }
 0x179   : > { %v642_v53 = vpack.c.bf16 %v632_v52, %v631_v51 }
 0x17b   : > { %1062 = vmatmul.msk.bf16.gmra.mxu2 %vm547_vm1, %v642_v53 }
 0x17c   : > { %v611_v54 = vpop.f32.mrf.mxu1 }
 0x17d   : > { %v612_v55 = vadd.f32 %v1267_v12, %v611_v54 }
 0x17f   : > { %v633_v58 = vmax.f32 %v612_v55, 0.0 }
 0x184   : > { %v613_v56 = vpop.f32.mrf.mxu1 }
 0x185   : > { %v614_v57 = vadd.f32 %v1267_v12, %v613_v56 }
 0x187   : > { %v634_v59 = vmax.f32 %v614_v57, 0.0 }
 0x189   : > { %v643_v60 = vpack.c.bf16 %v634_v59, %v633_v58 }
 0x18b   : > { %1063 = vmatmul.msk.bf16.gmra.mxu2 %vm547_vm1, %v643_v60 }
 0x18c   : > { %v616_v61 = vpop.f32.mrf.mxu1 }
 0x18d   : > { %v617_v0 = vadd.f32 %v1267_v12, %v616_v61 }
 0x18f   : > { %v635_v4 = vmax.f32 %v617_v0, 0.0 }
 0x194   : > { %v618_v1 = vpop.f32.mrf.mxu1 }
 0x195   : > { %v619_v3 = vadd.f32 %v1267_v12, %v618_v1  ;;  %v1124_v1 = vld [vmem:[%s1368_s8] ss:$0 sm:$0xff] }
 0x197   : > { %v636_v5 = vmax.f32 %v619_v3, 0.0 }
 0x199   : > { %v644_v7 = vpack.c.bf16 %v636_v5, %v635_v4 }
 0x19b   : > { %1064 = vmatmul.msk.bf16.gmra.mxu2 %vm547_vm1, %v644_v7 }
 0x1ae   : > { %v714_v8 = vpop.f32.mrf.mxu2 }
 0x1af   : > { %v715_v10 = vadd.f32 %v1123_v9, %v714_v8 }
 0x1b1   : > { %v754_v12 = vmax.f32 %v715_v10, 0.0 }
 0x1b6   : > { %v716_v11 = vpop.f32.mrf.mxu2 }
 0x1b7   : > { %v717_v13 = vadd.f32 %v1123_v9, %v716_v11 }
 0x1b9   : > { %v755_v14 = vmax.f32 %v717_v13, 0.0 }
 0x1bb   : > { %v770_v16 = vpack.c.bf16 %v755_v14, %v754_v12 }
 0x1bd   : > { %1081 = vmatmul.msk.bf16.vlgmr.msra.gmra.mxu3 %vm547_vm1, %v770_v16 }
 0x1be   : > { %v719_v17 = vpop.f32.mrf.mxu2 }
 0x1bf   : > { %v720_v18 = vadd.f32 %v1123_v9, %v719_v17 }
 0x1c1   : > { %v756_v20 = vmax.f32 %v720_v18, 0.0 }
 0x1c6   : > { %v721_v19 = vpop.f32.mrf.mxu2 }
 0x1c7   : > { %v722_v15 = vadd.f32 %v1123_v9, %v721_v19 }
 0x1c9   : > { %v757_v21 = vmax.f32 %v722_v15, 0.0 }
 0x1cb   : > { %v771_v22 = vpack.c.bf16 %v757_v21, %v756_v20 }
 0x1cd   : > { %1082 = vmatmul.msk.bf16.gmra.mxu3 %vm547_vm1, %v771_v22 }
 0x1ce   : > { %v724_v23 = vpop.f32.mrf.mxu2 }
 0x1cf   : > { %v725_v24 = vadd.f32 %v1123_v9, %v724_v23 }
 0x1d1   : > { %v758_v27 = vmax.f32 %v725_v24, 0.0 }
 0x1d6   : > { %v726_v25 = vpop.f32.mrf.mxu2 }
 0x1d7   : > { %v727_v26 = vadd.f32 %v1123_v9, %v726_v25 }
 0x1d9   : > { %v759_v28 = vmax.f32 %v727_v26, 0.0 }
 0x1db   : > { %v772_v29 = vpack.c.bf16 %v759_v28, %v758_v27 }
 0x1dd   : > { %1083 = vmatmul.msk.bf16.gmra.mxu3 %vm547_vm1, %v772_v29 }
 0x1de   : > { %v729_v30 = vpop.f32.mrf.mxu2 }
 0x1df   : > { %v730_v31 = vadd.f32 %v1123_v9, %v729_v30 }
 0x1e1   : > { %v760_v34 = vmax.f32 %v730_v31, 0.0 }
 0x1e6   : > { %v731_v32 = vpop.f32.mrf.mxu2 }
 0x1e7   : > { %v732_v33 = vadd.f32 %v1123_v9, %v731_v32 }
 0x1e9   : > { %v761_v35 = vmax.f32 %v732_v33, 0.0 }
 0x1eb   : > { %v773_v36 = vpack.c.bf16 %v761_v35, %v760_v34 }
 0x1ed   : > { %1084 = vmatmul.msk.bf16.gmra.mxu3 %vm547_vm1, %v773_v36 }
 0x1ee   : > { %v734_v37 = vpop.f32.mrf.mxu2 }
 0x1ef   : > { %v735_v38 = vadd.f32 %v1123_v9, %v734_v37 }
 0x1f1   : > { %v762_v41 = vmax.f32 %v735_v38, 0.0 }
 0x1f6   : > { %v736_v39 = vpop.f32.mrf.mxu2 }
 0x1f7   : > { %v737_v40 = vadd.f32 %v1123_v9, %v736_v39 }
 0x1f9   : > { %v763_v42 = vmax.f32 %v737_v40, 0.0 }
 0x1fb   : > { %v774_v43 = vpack.c.bf16 %v763_v42, %v762_v41 }
 0x1fd   : > { %1085 = vmatmul.msk.bf16.gmra.mxu3 %vm547_vm1, %v774_v43 }
 0x1fe   : > { %v739_v44 = vpop.f32.mrf.mxu2 }
 0x1ff   : > { %v740_v45 = vadd.f32 %v1123_v9, %v739_v44 }
 0x201   : > { %v764_v48 = vmax.f32 %v740_v45, 0.0 }
 0x206   : > { %v741_v46 = vpop.f32.mrf.mxu2 }
 0x207   : > { %v742_v47 = vadd.f32 %v1123_v9, %v741_v46 }
 0x209   : > { %v765_v49 = vmax.f32 %v742_v47, 0.0 }
 0x20b   : > { %v775_v50 = vpack.c.bf16 %v765_v49, %v764_v48 }
 0x20d   : > { %1086 = vmatmul.msk.bf16.gmra.mxu3 %vm547_vm1, %v775_v50 }
 0x20e   : > { %v744_v51 = vpop.f32.mrf.mxu2 }
 0x20f   : > { %v745_v52 = vadd.f32 %v1123_v9, %v744_v51 }
 0x211   : > { %v766_v55 = vmax.f32 %v745_v52, 0.0 }
 0x216   : > { %v746_v53 = vpop.f32.mrf.mxu2 }
 0x217   : > { %v747_v54 = vadd.f32 %v1123_v9, %v746_v53 }
 0x219   : > { %v767_v56 = vmax.f32 %v747_v54, 0.0 }
 0x21b   : > { %v776_v57 = vpack.c.bf16 %v767_v56, %v766_v55 }
 0x21d   : > { %1087 = vmatmul.msk.bf16.gmra.mxu3 %vm547_vm1, %v776_v57 }
 0x21e   : > { %v749_v58 = vpop.f32.mrf.mxu2 }
 0x21f   : > { %v750_v59 = vadd.f32 %v1123_v9, %v749_v58 }
 0x221   : > { %v768_v62 = vmax.f32 %v750_v59, 0.0 }
 0x226   : > { %v751_v60 = vpop.f32.mrf.mxu2 }
 0x227   : > { %v752_v61 = vadd.f32 %v1123_v9, %v751_v60 }
 0x229   : > { %v769_v63 = vmax.f32 %v752_v61, 0.0 }
 0x22b   : > { %v777_v0 = vpack.c.bf16 %v769_v63, %v768_v62 }
 0x22d   : > { %1088 = vmatmul.msk.bf16.gmra.mxu3 %vm547_vm1, %v777_v0 }
 0x240   : > { %v847_v2 = vpop.f32.mrf.mxu3 }
 0x241   : > { %v848_v3 = vadd.f32 %v1124_v1, %v847_v2 }
 0x243   : > { %888 = vst.msk [vmem:[%s1323_s17] sm:$0xff] %vm887_vm2, %v848_v3 }
 0x248   : > { %v849_v4 = vpop.f32.mrf.mxu3 }
 0x249   : > { %v850_v5 = vadd.f32 %v1124_v1, %v849_v4 }
 0x24b   : > { %889 = vst.msk [vmem:[%s1323_s17 + $0x8] sm:$0xff] %vm887_vm2, %v850_v5 }
 0x250   : > { %v852_v6 = vpop.f32.mrf.mxu3 }
 0x251   : > { %v853_v7 = vadd.f32 %v1124_v1, %v852_v6 }
 0x253   : > { %890 = vst.msk [vmem:[%s1323_s17 + $0x10] sm:$0xff] %vm887_vm2, %v853_v7 }
 0x258   : > { %v854_v8 = vpop.f32.mrf.mxu3 }
 0x259   : > { %v855_v9 = vadd.f32 %v1124_v1, %v854_v8 }
 0x25b   : > { %891 = vst.msk [vmem:[%s1323_s17 + $0x18] sm:$0xff] %vm887_vm2, %v855_v9 }
 0x260   : > { %v857_v10 = vpop.f32.mrf.mxu3 }
 0x261   : > { %v858_v11 = vadd.f32 %v1124_v1, %v857_v10 }
 0x263   : > { %892 = vst.msk [vmem:[%s1323_s17 + $0x20] sm:$0xff] %vm887_vm2, %v858_v11 }
 0x268   : > { %v859_v13 = vpop.f32.mrf.mxu3 }
 0x269   : > { %v860_v12 = vadd.f32 %v1124_v1, %v859_v13 }
 0x26b   : > { %893 = vst.msk [vmem:[%s1323_s17 + $0x28] sm:$0xff] %vm887_vm2, %v860_v12 }
 0x270   : > { %v862_v14 = vpop.f32.mrf.mxu3 }
 0x271   : > { %v863_v16 = vadd.f32 %v1124_v1, %v862_v14 }
 0x273   : > { %894 = vst.msk [vmem:[%s1323_s17 + $0x30] sm:$0xff] %vm887_vm2, %v863_v16 }
 0x278   : > { %v864_v17 = vpop.f32.mrf.mxu3 }
 0x279   : > { %v865_v18 = vadd.f32 %v1124_v1, %v864_v17 }
 0x27b   : > { %895 = vst.msk [vmem:[%s1323_s17 + $0x38] sm:$0xff] %vm887_vm2, %v865_v18 }
 0x280   : > { %v867_v19 = vpop.f32.mrf.mxu3 }
 0x281   : > { %v868_v15 = vadd.f32 %v1124_v1, %v867_v19 }
 0x283   : > { %896 = vst.msk [vmem:[%s1323_s17 + $0x40] sm:$0xff] %vm887_vm2, %v868_v15 }
 0x288   : > { %v869_v20 = vpop.f32.mrf.mxu3 }
 0x289   : > { %v870_v21 = vadd.f32 %v1124_v1, %v869_v20 }
 0x28b   : > { %897 = vst.msk [vmem:[%s1323_s17 + $0x48] sm:$0xff] %vm887_vm2, %v870_v21 }
 0x290   : > { %v872_v22 = vpop.f32.mrf.mxu3 }
 0x291   : > { %v873_v23 = vadd.f32 %v1124_v1, %v872_v22 }
 0x293   : > { %898 = vst.msk [vmem:[%s1323_s17 + $0x50] sm:$0xff] %vm887_vm2, %v873_v23 }
 0x298   : > { %v874_v24 = vpop.f32.mrf.mxu3 }
 0x299   : > { %v875_v25 = vadd.f32 %v1124_v1, %v874_v24 }
 0x29b   : > { %899 = vst.msk [vmem:[%s1323_s17 + $0x58] sm:$0xff] %vm887_vm2, %v875_v25 }
 0x2a0   : > { %v877_v26 = vpop.f32.mrf.mxu3 }
 0x2a1   : > { %v878_v27 = vadd.f32 %v1124_v1, %v877_v26 }
 0x2a3   : > { %900 = vst.msk [vmem:[%s1323_s17 + $0x60] sm:$0xff] %vm887_vm2, %v878_v27 }
 0x2a8   : > { %v879_v28 = vpop.f32.mrf.mxu3 }
 0x2a9   : > { %v880_v29 = vadd.f32 %v1124_v1, %v879_v28 }
 0x2ab   : > { %901 = vst.msk [vmem:[%s1323_s17 + $0x68] sm:$0xff] %vm887_vm2, %v880_v29 }
 0x2b0   : > { %v882_v30 = vpop.f32.mrf.mxu3 }
 0x2b1   : > { %v883_v31 = vadd.f32 %v1124_v1, %v882_v30 }
 0x2b3   : > { %902 = vst.msk [vmem:[%s1323_s17 + $0x70] sm:$0xff] %vm887_vm2, %v883_v31 }
 0x2b8   : > { %v884_v32 = vpop.f32.mrf.mxu3 }
 0x2b9   : > { %v885_v33 = vadd.f32 %v1124_v1, %v884_v32 }
 0x2bb   : > { %903 = vst.msk [vmem:[%s1323_s17 + $0x78] sm:$0xff] %vm887_vm2, %v885_v33 }
 0x2bc PF: > { %s19_s30 = sadd.s32 1, %s1131_s30  }
 0x2bd   : > { %p16_p4 = scmp.ge.s32.totalorder %s19_s30, 4  }
 0x2bf   :  { %18 = sbr.rel (!%p16_p4) target bundleno = 1 (0x1), region = 86 }

</bundles_post_ra>
